<compile_context>
chip_gen: v5e
topology: v5e:2x2
jax: 0.10.0
libtpu: 0.0.40
codegen_flags: <defaults>
</compile_context>

<pallas_src>
import jax
import jax.numpy as jnp
from jax.experimental import pallas as pl
from jax.experimental.pallas import tpu as pltpu


def _round_up(x, m):
    return ((x + m - 1) // m) * m


def _pick_spatial_tile(hw):
    """Largest convenient tile of output pixels per grid step."""
    if hw <= 1024:
        return hw                      # single step per batch element
    for cand in (1024, 512, 256, 128, 64, 32, 16, 8):
        if hw % cand == 0:
            return cand
    return hw                          # fallback: whole image in one step


def _im2col_3x3(x_nhwc):
    """(B,H,W,Cin) -> (B, H*W, 9*Cin) patches, K ordered (kh, kw, cin)."""
    B, H, W, Cin = x_nhwc.shape
    xp = jnp.pad(x_nhwc, ((0, 0), (1, 1), (1, 1), (0, 0)))
    cols = jnp.concatenate(
        [xp[:, kh:kh + H, kw:kw + W, :] for kh in range(3) for kw in range(3)],
        axis=-1)                                   # (B, H, W, 9*Cin)
    return cols.reshape(B, H * W, 9 * Cin)


def _make_fused_kernel(HW, TS, E_pad):
    inv_hw = 1.0 / float(HW)

    def kernel(cols_ref, w_ref, cb_ref, ew_ref, eb_ref, o_ref, sum_ref):
        # cols_ref: (1, TS, K_pad)  bf16  im2col patches for TS pixels of batch b
        # w_ref:    (K_pad, Cout)   bf16  conv weights (K zero-padded to 128)
        # cb_ref:   (1, Cout)       f32   conv bias
        # ew_ref:   (Cout, E_pad)   bf16  embed weight, zero-padded to 128 lanes
        # eb_ref:   (1, E_pad)      f32   embed bias, zero-padded
        # o_ref:    (1, 1, E_pad)   f32   embedding for batch b
        # sum_ref:  (1, Cout)       f32   running spatial sum (VMEM scratch)
        r = pl.program_id(1)
        nr = pl.num_programs(1)

        @pl.when(r == 0)
        def _init():
            sum_ref[...] = jnp.zeros_like(sum_ref)

        # 3x3 conv over TS output pixels == one (TS, 128) x (128, Cout) MXU
        # matmul on bf16 operands with f32 accumulation.
        acc = jnp.dot(cols_ref[0], w_ref[...],
                      preferred_element_type=jnp.float32)          # (TS, Cout) f32
        acc = jnp.maximum(acc + cb_ref[...], 0.0)                  # bias + ReLU (f32)
        sum_ref[...] += jnp.sum(acc, axis=0, keepdims=True)        # (1, Cout) f32

        @pl.when(r == nr - 1)
        def _pool_embed_epilogue():
            pooled = sum_ref[...] * inv_hw                         # global avg pool
            emb = jnp.dot(pooled.astype(ew_ref.dtype), ew_ref[...],
                          preferred_element_type=jnp.float32)      # (1, E_pad) f32
            o_ref[0] = (emb + eb_ref[...]).astype(o_ref.dtype)

    return kernel


def encoder_cnn_forward(images_nchw, conv_w, conv_b, embed_w, embed_b,
                        *, spatial_tile=None):
    """conv3x3+ReLU ("resnet" stand-in) -> global avg pool -> Linear embed."""
    B, Cin, H, W = images_nchw.shape
    Cout = conv_w.shape[-1]
    Cfeat, E = embed_w.shape
    assert conv_w.shape == (3, 3, Cin, Cout) and Cfeat == Cout

    HW = H * W
    TS = _pick_spatial_tile(HW) if spatial_tile is None else spatial_tile
    assert HW % TS == 0 and (TS == HW or TS % 8 == 0)
    nr = HW // TS

    K = 9 * Cin
    K_pad = _round_up(max(K, 128), 128)        # lane-dense MXU contraction dim
    E_pad = _round_up(max(E, 128), 128)        # lane-dense output store

    # One-time glue (plain JAX): NCHW->NHWC, bf16 quantization, im2col packing
    # into a lane-dense (B, HW, K_pad) slab, weight/bias re-layout + zero-pad.
    x = jnp.transpose(images_nchw, (0, 2, 3, 1)).astype(jnp.bfloat16)
    cols = _im2col_3x3(x)                                          # (B, HW, 9*Cin) bf16
    cols = jnp.pad(cols, ((0, 0), (0, 0), (0, K_pad - K)))
    w2d = jnp.zeros((K_pad, Cout), jnp.bfloat16).at[:K, :].set(
        conv_w.reshape(K, Cout).astype(jnp.bfloat16))              # K order (kh, kw, cin)
    cb = conv_b.reshape(1, Cout).astype(jnp.float32)
    ew = jnp.zeros((Cout, E_pad), jnp.bfloat16).at[:, :E].set(
        embed_w.astype(jnp.bfloat16))
    eb = jnp.zeros((1, E_pad), jnp.float32).at[0, :E].set(
        embed_b.astype(jnp.float32))

    kernel = _make_fused_kernel(HW, TS, E_pad)

    out = pl.pallas_call(
        kernel,
        out_shape=jax.ShapeDtypeStruct((B, 1, E_pad), jnp.float32),
        grid_spec=pltpu.PrefetchScalarGridSpec(
            num_scalar_prefetch=0,
            grid=(B, nr),                          # reduction (spatial-tile) axis last
            in_specs=[
                pl.BlockSpec((1, TS, K_pad), lambda b, r: (b, r, 0)),
                pl.BlockSpec((K_pad, Cout), lambda b, r: (0, 0)),
                pl.BlockSpec((1, Cout), lambda b, r: (0, 0)),
                pl.BlockSpec((Cout, E_pad), lambda b, r: (0, 0)),
                pl.BlockSpec((1, E_pad), lambda b, r: (0, 0)),
            ],
            out_specs=pl.BlockSpec((1, 1, E_pad), lambda b, r: (b, 0, 0)),
            scratch_shapes=[
                pltpu.VMEM((1, Cout), jnp.float32),
            ],
        ),
        compiler_params=pltpu.CompilerParams(
            dimension_semantics=("parallel", "arbitrary"),
            vmem_limit_bytes=32 * 1024 * 1024,
        ),
    )(cols, w2d, cb, ew, eb)
    return out[:, 0, :E]


if __name__ == "__main__":
    key = jax.random.PRNGKey(0)
    k_img, k_cw, k_cb, k_ew, k_eb = jax.random.split(key, 5)

    # Small deterministic synthetic shapes (C_feat stands in for
    # resnet.fc.in_features = 2048 at reduced scale).
    B, Cin, H, W = 2, 3, 16, 16
    C_feat, embed_size = 128, 32

    images = jax.random.normal(k_img, (B, Cin, H, W), jnp.float32)            # NCHW like torch
    conv_w = jax.random.normal(k_cw, (3, 3, Cin, C_feat), jnp.float32) * 0.1  # HWIO
    conv_b = jax.random.normal(k_cb, (C_feat,), jnp.float32) * 0.1
    embed_w = jax.random.normal(k_ew, (C_feat, embed_size), jnp.float32) * 0.05  # = torch W.T
    embed_b = jax.random.normal(k_eb, (embed_size,), jnp.float32) * 0.05

    out = encoder_cnn_forward(images, conv_w, conv_b, embed_w, embed_b)
    out = jax.block_until_ready(out)
    assert out.shape == (B, embed_size), out.shape

    # Pure-JAX reference: same bf16 quantization of inputs/weights, f32 math.
    xq = images.astype(jnp.bfloat16).astype(jnp.float32)
    cwq = conv_w.astype(jnp.bfloat16).astype(jnp.float32)
    ewq = embed_w.astype(jnp.bfloat16).astype(jnp.float32)
    ref_feat = jax.lax.conv_general_dilated(
        xq, jnp.transpose(cwq, (3, 2, 0, 1)),                # OIHW
        window_strides=(1, 1), padding="SAME",
        dimension_numbers=("NCHW", "OIHW", "NCHW"))
    ref_feat = jnp.maximum(ref_feat + conv_b[None, :, None, None], 0.0)
    ref_pooled = jnp.mean(ref_feat, axis=(2, 3))             # avgpool + flatten
    ref_out = ref_pooled @ ewq + embed_b                     # Linear embed
    max_err = float(jnp.max(jnp.abs(out - ref_out)))
    assert jnp.allclose(out, ref_out, atol=1e-2, rtol=1e-2), max_err

    print("KERNEL_OK")
</pallas_src>

<mosaic_0001>
module attributes {stable_mosaic.version = 11 : i64} {
  func.func @kernel(%arg0: i32, %arg1: i32, %arg2: memref<1x256x128xbf16, #tpu.memory_space<vmem>>, %arg3: memref<128x128xbf16, #tpu.memory_space<vmem>>, %arg4: memref<1x128xf32, #tpu.memory_space<vmem>>, %arg5: memref<128x128xbf16, #tpu.memory_space<vmem>>, %arg6: memref<1x128xf32, #tpu.memory_space<vmem>>, %arg7: memref<1x1x128xf32, #tpu.memory_space<vmem>>, %arg8: memref<1x128xf32, #tpu.memory_space<vmem>>) attributes {dimension_semantics = [#tpu.dimension_semantics<parallel>, #tpu.dimension_semantics<arbitrary>], iteration_bounds = array<i64: 2, 1>, scalar_prefetch = 0 : i64, scratch_operands = 1 : i64, tpu.core_type = #tpu.core_type<tc>, window_params = [{transform_indices = @transform_0, window_bounds = array<i64: 1, 256, 128>}, {pipeline_mode = #tpu.pipeline_mode<synchronous>, transform_indices = @transform_1, window_bounds = array<i64: 128, 128>}, {pipeline_mode = #tpu.pipeline_mode<synchronous>, transform_indices = @transform_2, window_bounds = array<i64: 1, 128>}, {pipeline_mode = #tpu.pipeline_mode<synchronous>, transform_indices = @transform_3, window_bounds = array<i64: 128, 128>}, {pipeline_mode = #tpu.pipeline_mode<synchronous>, transform_indices = @transform_4, window_bounds = array<i64: 1, 128>}, {transform_indices = @transform_5, window_bounds = array<i64: 1, 1, 128>}]} {
    %c0_i32 = arith.constant 0 : i32
    %0 = arith.cmpi eq, %arg1, %c0_i32 : i32
    %1 = arith.extui %0 : i1 to i32
    %c0_i32_0 = arith.constant 0 : i32
    %2 = arith.cmpi ne, %1, %c0_i32_0 : i32
    scf.if %2 {
      %cst_15 = arith.constant 0.000000e+00 : f32
      %20 = vector.broadcast %cst_15 : f32 to vector<1x128xf32>
      %c0_16 = arith.constant 0 : index
      %c0_17 = arith.constant 0 : index
      %21 = vector.load %arg8[%c0_16, %c0_17] : memref<1x128xf32, #tpu.memory_space<vmem>>, vector<1x128xf32>
      tpu.vector_store %arg8[%c0_16, %c0_17], %20 {strides = array<i32>} : memref<1x128xf32, #tpu.memory_space<vmem>>, vector<1x128xf32>,
    } else {
    }
    %c0 = arith.constant 0 : index
    %c0_1 = arith.constant 0 : index
    %c0_2 = arith.constant 0 : index
    %3 = vector.load %arg2[%c0, %c0_1, %c0_2] : memref<1x256x128xbf16, #tpu.memory_space<vmem>>, vector<1x256x128xbf16>
    %4 = vector.shape_cast %3 : vector<1x256x128xbf16> to vector<256x128xbf16>
    %c0_3 = arith.constant 0 : index
    %c0_4 = arith.constant 0 : index
    %5 = vector.load %arg3[%c0_3, %c0_4] : memref<128x128xbf16, #tpu.memory_space<vmem>>, vector<128x128xbf16>
    %cst = arith.constant dense<0.000000e+00> : vector<256x128xf32>
    %6 = tpu.matmul %4, %5, %cst {dimension_numbers = #tpu.dot_dimension_numbers<[1], [0], [0], [1], [0, 0, 1, 1], [], []>} : vector<256x128xbf16>, vector<128x128xbf16>, vector<256x128xf32> -> vector<256x128xf32>
    %c0_5 = arith.constant 0 : index
    %c0_6 = arith.constant 0 : index
    %7 = vector.load %arg4[%c0_5, %c0_6] : memref<1x128xf32, #tpu.memory_space<vmem>>, vector<1x128xf32>
    %8 = vector.broadcast %7 : vector<1x128xf32> to vector<256x128xf32>
    %9 = arith.addf %6, %8 : vector<256x128xf32>
    %cst_7 = arith.constant 0.000000e+00 : f32
    %10 = vector.broadcast %cst_7 : f32 to vector<256x128xf32>
    %11 = arith.maximumf %9, %10 : vector<256x128xf32>
    %c0_8 = arith.constant 0 : index
    %c0_9 = arith.constant 0 : index
    %12 = vector.load %arg8[%c0_8, %c0_9] : memref<1x128xf32, #tpu.memory_space<vmem>>, vector<1x128xf32>
    %cst_10 = arith.constant dense<0.000000e+00> : vector<128xf32>
    %13 = vector.multi_reduction <add>, %11, %cst_10 [0] : vector<256x128xf32> to vector<128xf32>
    %14 = vector.shape_cast %13 : vector<128xf32> to vector<1x128xf32>
    %15 = arith.addf %12, %14 : vector<1x128xf32>
    %c0_11 = arith.constant 0 : index
    %c0_12 = arith.constant 0 : index
    %16 = vector.load %arg8[%c0_11, %c0_12] : memref<1x128xf32, #tpu.memory_space<vmem>>, vector<1x128xf32>
    tpu.vector_store %arg8[%c0_11, %c0_12], %15 {strides = array<i32>} : memref<1x128xf32, #tpu.memory_space<vmem>>, vector<1x128xf32>,
    %c0_i32_13 = arith.constant 0 : i32
    %17 = arith.cmpi eq, %arg1, %c0_i32_13 : i32
    %18 = arith.extui %17 : i1 to i32
    %c0_i32_14 = arith.constant 0 : i32
    %19 = arith.cmpi ne, %18, %c0_i32_14 : i32
    scf.if %19 {
      %c0_15 = arith.constant 0 : index
      %c0_16 = arith.constant 0 : index
      %20 = vector.load %arg8[%c0_15, %c0_16] : memref<1x128xf32, #tpu.memory_space<vmem>>, vector<1x128xf32>
      %cst_17 = arith.constant 3.906250e-03 : f32
      %21 = vector.broadcast %cst_17 : f32 to vector<1x128xf32>
      %22 = arith.mulf %20, %21 : vector<1x128xf32>
      %23 = arith.truncf %22 : vector<1x128xf32> to vector<1x128xbf16>
      %c0_18 = arith.constant 0 : index
      %c0_19 = arith.constant 0 : index
      %24 = vector.load %arg5[%c0_18, %c0_19] : memref<128x128xbf16, #tpu.memory_space<vmem>>, vector<128x128xbf16>
      %cst_20 = arith.constant dense<0.000000e+00> : vector<1x128xf32>
      %25 = tpu.matmul %23, %24, %cst_20 {dimension_numbers = #tpu.dot_dimension_numbers<[1], [0], [0], [1], [0, 0, 1, 1], [], []>} : vector<1x128xbf16>, vector<128x128xbf16>, vector<1x128xf32> -> vector<1x128xf32>
      %c0_21 = arith.constant 0 : index
      %c0_22 = arith.constant 0 : index
      %26 = vector.load %arg6[%c0_21, %c0_22] : memref<1x128xf32, #tpu.memory_space<vmem>>, vector<1x128xf32>
      %27 = arith.addf %25, %26 : vector<1x128xf32>
      %c0_23 = arith.constant 0 : index
      %c0_24 = arith.constant 0 : index
      %c0_25 = arith.constant 0 : index
      %28 = vector.load %arg7[%c0_23, %c0_24, %c0_25] : memref<1x1x128xf32, #tpu.memory_space<vmem>>, vector<1x1x128xf32>
      %29 = vector.shape_cast %28 : vector<1x1x128xf32> to vector<1x128xf32>
      %30 = vector.shape_cast %27 : vector<1x128xf32> to vector<1x1x128xf32>
      tpu.vector_store %arg7[%c0_23, %c0_24, %c0_25], %30 {strides = array<i32>} : memref<1x1x128xf32, #tpu.memory_space<vmem>>, vector<1x1x128xf32>,
    } else {
    }
    return
  }
  func.func @transform_0(%arg0: i32, %arg1: i32) -> (i32, i32, i32) {
    %c0_i32 = arith.constant 0 : i32
    %c0_i32_0 = arith.constant 0 : i32
    return %arg0, %arg1, %c0_i32 : i32, i32, i32
  }
  func.func @transform_1(%arg0: i32, %arg1: i32) -> (i32, i32) {
    %c0_i32 = arith.constant 0 : i32
    %c0_i32_0 = arith.constant 0 : i32
    %c0_i32_1 = arith.constant 0 : i32
    return %c0_i32, %c0_i32_0 : i32, i32
  }
  func.func @transform_2(%arg0: i32, %arg1: i32) -> (i32, i32) {
    %c0_i32 = arith.constant 0 : i32
    %c0_i32_0 = arith.constant 0 : i32
    %c0_i32_1 = arith.constant 0 : i32
    return %c0_i32, %c0_i32_0 : i32, i32
  }
  func.func @transform_3(%arg0: i32, %arg1: i32) -> (i32, i32) {
    %c0_i32 = arith.constant 0 : i32
    %c0_i32_0 = arith.constant 0 : i32
    %c0_i32_1 = arith.constant 0 : i32
    return %c0_i32, %c0_i32_0 : i32, i32
  }
  func.func @transform_4(%arg0: i32, %arg1: i32) -> (i32, i32) {
    %c0_i32 = arith.constant 0 : i32
    %c0_i32_0 = arith.constant 0 : i32
    %c0_i32_1 = arith.constant 0 : i32
    return %c0_i32, %c0_i32_0 : i32, i32
  }
  func.func @transform_5(%arg0: i32, %arg1: i32) -> (i32, i32, i32) {
    %c0_i32 = arith.constant 0 : i32
    %c0_i32_0 = arith.constant 0 : i32
    %c0_i32_1 = arith.constant 0 : i32
    return %arg0, %c0_i32, %c0_i32_0 : i32, i32, i32
  }
}

</mosaic_0001>

<bundles_post_ra>
// kernel: tpu_custom_call.1
= control target key start
LH: loop header
LB: loop body
LE: loop exit
PB: predicated region body
PF: predicated region fallthrough
CT: control target
= control target key end

     0   :  { %s1582_s0 = inlined_call_operand.hbm [shape: bf16[2,256,128], index: 0, kind: input, shape index: {}]   ;;  %s1583_s1 = inlined_call_operand.hbm [shape: bf16[128,128], index: 1, kind: input, shape index: {}]   ;;  %s1584_s2 = inlined_call_operand.vmem [shape: f32[1,128], index: 2, kind: input, shape index: {}]   ;;  %s1585_s3 = inlined_call_operand.hbm [shape: bf16[128,128], index: 3, kind: input, shape index: {}]   ;;  %s1586_s4 = inlined_call_operand.vmem [shape: f32[1,128], index: 4, kind: input, shape index: {}]   ;;  %s1587_s5 = inlined_call_operand.hbm [shape: f32[2,1,128], index: 5, kind: output, shape index: {}]  }
   0x1   :  { %1590 = sst [smem:[#allocation13_spill]] %s1583_s1 }
   0x2   :  { %1591 = sst [smem:[#allocation14_spill]] %s1585_s3 }
   0x3   :  { %10 = vsyncpa [#allocation4], 0 }
   0x4   :  { %12 = vsyncpa [#allocation4 + $0x1], 0 }
   0x5   :  { %13 = vsyncpa [#allocation7], 0 }
   0x6   :  { %14 = vsyncpa [#allocation5], 0 }
   0x7   :  { %16 = vsyncpa [#allocation5 + $0x1], 0  ;;  %s1350_s18 = smov 0   ;;  %s1352_s19 = smov 0  }
   0x8   :  { %s1354_s20 = smov 0   ;;  %s1356_s21 = smov 0  }
   0x9   :  { %s1358_s22 = smov 0   ;;  %s1360_s23 = smov 0  }
   0xa LB: > { %s850_s24 = sadd.s32 4294967295, %s1313_s23   ;;  %s851_s25 = sadd.s32 4294967294, %s1313_s23   ;;  %s1313_s23 = sphi %s1360_s23, %s22_s23   ;;  %s1309_s22 = sphi %s1358_s22, %s1605_s22   ;;  %s1305_s21 = sphi %s1356_s21, %s1604_s21   ;;  %s1301_s20 = sphi %s1354_s20, %s1603_s20   ;;  %s1297_s19 = sphi %s1352_s19, %s1602_s19   ;;  %s1293_s18 = sphi %s1350_s18, %s1601_s18  }
   0xb   : > { %p56_p0 = scmp.ne.s32.totalorder %s1297_s19, %s1293_s18  ;;  %p1386_p1 = scmp.eq.s32.totalorder %s850_s24, 0 }
   0xc   : > { %p170_p2 = scmp.eq.s32.totalorder %s851_s25, 1  ;;  %p852_p4 = scmp.ge.s32.totalorder %s1313_s23, 1 }
   0xd   : > { %p1392_p3 = por %p1386_p1, %p56_p0  ;;  %p177_p6 = scmp.lt.s32.totalorder %s1313_s23, 3 }
   0xe   : > { %p1397_p5 = por %p170_p2, %p56_p0  ;;  %s1595_s1 = sld [smem:[#allocation13_spill]] }
   0xf   : > { %p1405_p7 = pnand %p852_p4, %p177_p6  ;;  %s1315_s8 = smov [#allocation6]  }
  0x10   : > { %s190_s9 = sshll.u32 %s1315_s8, 4  ;;  %p855_p10 = scmp.ge.s32.totalorder %s1313_s23, 2  ;;  %s191_s9 = int_to_ptr.vmem [resolvable:$true] %s190_s9 }
  0x11   : > { %p1062_p8 = pneg %p1405_p7  ;;  %s1597_s3 = sld [smem:[#allocation14_spill]] }
  0x12   : > { %s1588_s13 = smov 64   ;;  %s1589_s14 = smov 4  }
  0x13   : > { %p1063_p9 = pnand %p1062_p8, %p1386_p1  ;;  %s1318_s15 = smov [#allocation8]  }
  0x14   : > { %s188_s6 = sshll.u32 %s1595_s1, 4  ;;  %s207_s16 = sshll.u32 %s1318_s15, 4  ;;  %s189_s6 = int_to_ptr.hbm [resolvable:$true] %s188_s6  ;;  %s208_s16 = int_to_ptr.vmem [resolvable:$true] %s207_s16 }
  0x15   : > { %1065 = dma.hbm_to_vmem [thread:$0]  (!%p1063_p9), %s189_s6, 1024, %s191_s9, [#allocation7], %s1588_s13, %s1588_s13, %s1589_s14  }
  0x16   : > { %p164_p11 = scmp.eq.s32.totalorder %s850_s24, 1  ;;  %s34_s17 = sadd.s32 1, %s1309_s22 }
  0x17   : > { %s205_s12 = sshll.u32 %s1597_s3, 4  ;;  %p36_p12 = scmp.ge.s32.totalorder %s34_s17, 2  ;;  %s206_s12 = int_to_ptr.hbm [resolvable:$true] %s205_s12 }
  0x18   : > { %1068 = dma.hbm_to_vmem [thread:$0]  (!%p1063_p9), %s206_s12, 1024, %s208_s16, [#allocation7], %s1588_s13, %s1588_s13, %s1589_s14  }
  0x19   : > { %s43_s25 = sadd.s32 1, %s1301_s20  ;;  %p50_p13 = scmp.ne.s32.totalorder %s1301_s20, %s1297_s19 }
  0x1a   : > { %p51_p0 = scmp.eq.s32.totalorder %s1313_s23, 0  ;;  %s1607_s17 = smov (%p36_p12, %s34_s17), 0 }
  0x1b   : > { %p1432_p2 = por %p164_p11, %p50_p13  ;;  %p1079_p4 = scmp.lt.s32.totalorder %s1313_s23, 2 }
  0x1c   : > { %s38_s30 = ssub.s32 %s1309_s22, %s1607_s17  ;;  %s224_s6 = sand.u32 1, %s1301_s20  }
  0x1d   : > { %p41_p6 = scmp.eq.s32.totalorder %s38_s30, 0  ;;  %p52_p8 = por %p51_p0, %p50_p13 }
  0x1e   : > { %s856_s8 = sshll.u32 %s224_s6, 7  ;;  %s993_s24 = sshll.u32 %s1309_s22, 7 }
  0x1f   : > { %s1442_s9 = scalar_select %p41_p6, %s1301_s20, %s43_s25  }
  0x20   : > { %s235_s12 = scalar_lea.hbm %s1582_s0, %s993_s24  ;;  %s228_s16 = scalar_lea.vmem [#allocation3], %s856_s8 }
  0x21   : > { %s236_s15 = sshll.u32 %s235_s12, 4  ;;  %s238_s13 = sshll.u32 %s228_s16, 4  ;;  %s237_s15 = int_to_ptr.hbm [resolvable:$true] %s236_s15  ;;  %s239_s13 = int_to_ptr.vmem [resolvable:$true] %s238_s13 }
  0x22   : > { %p1070_p9 = pnand %p1079_p4, %p52_p8  ;;  %s225_s14 = scalar_lea.sflag [#allocation4], %s224_s6 }
  0x23   : > { %s1599_s1 = smov 4   ;;  %s1600_s3 = smov 64  }
  0x24   : > { %1072 = dma.hbm_to_vmem [thread:$0]  (!%p1070_p9), %s237_s15, 2048, %s239_s13, %s225_s14, %s1600_s3, %s1600_s3, %s1599_s1  }
  0x25   : > { %250 = sbr.rel (%p1405_p7) target bundleno = 473 (0x1d9), region = 40  ;;  %s1455_s25 = sand.u32 (!%p1405_p7), 1, %s1297_s19  }
  0x26   : > { %s860_s30 = sshll.u32 (!%p1405_p7), %s1455_s25, 7  ;;  %s253_s8 = scalar_lea.sflag (!%p1405_p7), [#allocation4], %s1455_s25 }
  0x27   : > { %s1459_s24 = scalar_lea.vmem (!%p1405_p7), [#allocation3], %s860_s30 }
  0x2a   : > { %1280 = dma.done.wait (%p1392_p3), %s253_s8, 2048  }
  0x2b   : > { %1282 = vsyncadd (%p1392_p3), %s253_s8, 4294965248 }
  0x2c   : > { %1284 = dma.done.wait (%p1386_p1), [#allocation7], 2048  }
  0x2d   : > { %1286 = vsyncadd (%p1386_p1), [#allocation7], 4294965248  ;;  %v1017_v0 = vld [vmem:[#allocation6 + $0x38] sm:$0xff]  ;;  %v1016_v1 = vld [vmem:[#allocation6 + $0x30] sm:$0xff]  ;;  %s750_s7 = scalar_lea.hbm %s1587_s5, %s1305_s21  ;;  %s292_s6 = scalar_lea.vmem [#allocation9], %s1455_s25 }
  0x2e   : > { %495 = vmatpush.bf16.msra.mxu0 %v1017_v0  ;;  %1027 = vmatpush.bf16.msra.mxu2 %v1017_v0  ;;  %v1015_v2 = vld [vmem:[#allocation6 + $0x28] sm:$0xff]  ;;  %v1014_v3 = vld [vmem:[#allocation6 + $0x20] sm:$0xff]  ;;  %v1013_v4 = vld [vmem:[#allocation6 + $0x18] sm:$0xff]  ;;  %s752_s10 = sshll.u32 %s292_s6, 4  ;;  %s754_s11 = sshll.u32 %s750_s7, 4  ;;  %s753_s10 = int_to_ptr.vmem [resolvable:$true] %s752_s10  ;;  %s755_s11 = int_to_ptr.hbm [resolvable:$true] %s754_s11 }
  0x2f   : > { %1028 = vmatpush.bf16.msra.mxu3 %v1017_v0  ;;  %1026 = vmatpush.bf16.msra.mxu1 %v1017_v0  ;;  %v1012_v5 = vld [vmem:[#allocation6 + $0x10] sm:$0xff]  ;;  %v1011_v6 = vld [vmem:[#allocation6 + $0x8] sm:$0xff]  ;;  %v1010_v7 = vld [vmem:[#allocation6] sm:$0xff]  ;;  %s742_s12 = scalar_lea.sflag [#allocation5], %s1455_s25  ;;  %s1241_s15 = sshra.s32 %s755_s11, 4  ;;  %s1242_s15 = int_to_ptr.hbm [resolvable:$true] %s1241_s15 }
  0x30   : > { %v994_v8 = vld [vmem:[%s1459_s24] sm:$0xff]  ;;  %v1000_v9 = vld [vmem:[%s1459_s24 + $0x30] sm:$0xff]  ;;  %v1005_v10 = vld [vmem:[%s1459_s24 + $0x58] sm:$0xff]  ;;  %s1243_s16 = scalar_lea.hbm %s1242_s15, 1  ;;  %s1247_s8 = scalar_lea.hbm %s1587_s5, 2 }
  0x31   : > { %v998_v11 = vld [vmem:[%s1459_s24 + $0x20] sm:$0xff]  ;;  %v995_v12 = vld [vmem:[%s1459_s24 + $0x8] sm:$0xff]  ;;  %v1001_v13 = vld [vmem:[%s1459_s24 + $0x38] sm:$0xff]  ;;  %p1244_p1 = scmp.ne.s32.totalorder %s1242_s15, %s1243_s16  ;;  %p1248_p11 = scmp.lt.s32.totalorder %s1242_s15, %s1587_s5 }
  0x32   : > { %496 = vmatpush.bf16.msra.mxu0 %v1016_v1  ;;  %1030 = vmatpush.bf16.msra.mxu2 %v1016_v1  ;;  %v1006_v14 = vld [vmem:[%s1459_s24 + $0x60] sm:$0xff]  ;;  %v999_v15 = vld [vmem:[%s1459_s24 + $0x28] sm:$0xff]  ;;  %v996_v16 = vld [vmem:[%s1459_s24 + $0x10] sm:$0xff]  ;;  %p1249_p12 = scmp.lt.s32.totalorder %s1247_s8, %s1243_s16 }
  0x33   : > { %1031 = vmatpush.bf16.msra.mxu3 %v1016_v1  ;;  %1029 = vmatpush.bf16.msra.mxu1 %v1016_v1  ;;  %v1002_v17 = vld [vmem:[%s1459_s24 + $0x40] sm:$0xff]  ;;  %v1007_v18 = vld [vmem:[%s1459_s24 + $0x68] sm:$0xff]  ;;  %v997_v19 = vld [vmem:[%s1459_s24 + $0x18] sm:$0xff]  ;;  %p1245_p3 = pnand %p1244_p1, %p1432_p2 }
  0x34   : > { %v1003_v20 = vld [vmem:[%s1459_s24 + $0x48] sm:$0xff]  ;;  %v1008_v21 = vld [vmem:[%s1459_s24 + $0x70] sm:$0xff]  ;;  %v1009_v23 = vld [vmem:[%s1459_s24 + $0x78] sm:$0xff]  ;;  %p1250_p13 = por %p1249_p12, %p1248_p11 }
  0x35   : > { %v1004_v22 = vld [vmem:[%s1459_s24 + $0x50] sm:$0xff]  ;;  %v1494_v38 = vld [vmem:[%s1584_s2] ss:$0 sm:$0xff]  ;;  %p1246_p7 = pneg %p1245_p3 }
  0x36   : > { %497 = vmatpush.bf16.msra.mxu0 %v1015_v2  ;;  %1033 = vmatpush.bf16.msra.mxu2 %v1015_v2 }
  0x37   : > { %1034 = vmatpush.bf16.msra.mxu3 %v1015_v2  ;;  %1032 = vmatpush.bf16.msra.mxu1 %v1015_v2  ;;  %p1251_p0 = pnand %p1250_p13, %p1246_p7 }
  0x3a   : > { %498 = vmatpush.bf16.msra.mxu0 %v1014_v3  ;;  %1036 = vmatpush.bf16.msra.mxu2 %v1014_v3 }
  0x3b   : > { %1037 = vmatpush.bf16.msra.mxu3 %v1014_v3  ;;  %1035 = vmatpush.bf16.msra.mxu1 %v1014_v3 }
  0x3e   : > { %499 = vmatpush.bf16.msra.mxu0 %v1013_v4  ;;  %1039 = vmatpush.bf16.msra.mxu2 %v1013_v4 }
  0x3f   : > { %1040 = vmatpush.bf16.msra.mxu3 %v1013_v4  ;;  %1038 = vmatpush.bf16.msra.mxu1 %v1013_v4 }
  0x42   : > { %500 = vmatpush.bf16.msra.mxu0 %v1012_v5  ;;  %1042 = vmatpush.bf16.msra.mxu2 %v1012_v5 }
  0x43   : > { %1043 = vmatpush.bf16.msra.mxu3 %v1012_v5  ;;  %1041 = vmatpush.bf16.msra.mxu1 %v1012_v5 }
  0x46   : > { %501 = vmatpush.bf16.msra.mxu0 %v1011_v6  ;;  %1045 = vmatpush.bf16.msra.mxu2 %v1011_v6 }
  0x47   : > { %1046 = vmatpush.bf16.msra.mxu3 %v1011_v6  ;;  %1044 = vmatpush.bf16.msra.mxu1 %v1011_v6 }
  0x4a   : > { %502 = vmatpush.bf16.msra.mxu0 %v1010_v7  ;;  %1048 = vmatpush.bf16.msra.mxu2 %v1010_v7 }
  0x4b   : > { %1049 = vmatpush.bf16.msra.mxu3 %v1010_v7  ;;  %1047 = vmatpush.bf16.msra.mxu1 %v1010_v7 }
  0x4d   : > { %503 = vmatmul.bf16.vlgmr.msra.gmra.mxu0 %v994_v8  ;;  %533 = vmatmul.bf16.vlgmr.msra.gmra.mxu2 %v1000_v9 }
  0x4e   : > { %558 = vmatmul.bf16.vlgmr.msra.gmra.mxu3 %v1005_v10  ;;  %523 = vmatmul.bf16.vlgmr.msra.gmra.mxu1 %v998_v11 }
  0x5d   : > { %508 = vmatmul.bf16.gmra.mxu0 %v995_v12  ;;  %538 = vmatmul.bf16.gmra.mxu2 %v1001_v13 }
  0x5e   : > { %563 = vmatmul.bf16.gmra.mxu3 %v1006_v14  ;;  %528 = vmatmul.bf16.gmra.mxu1 %v999_v15 }
  0x6d   : > { %513 = vmatmul.bf16.gmra.mxu0 %v996_v16  ;;  %543 = vmatmul.bf16.gmra.mxu2 %v1002_v17 }
  0x6e   : > { %568 = vmatmul.bf16.gmra.mxu3 %v1007_v18 }
  0x7d   : > { %518 = vmatmul.bf16.gmra.mxu0 %v997_v19  ;;  %548 = vmatmul.bf16.gmra.mxu2 %v1003_v20 }
  0x7e   : > { %573 = vmatmul.bf16.gmra.mxu3 %v1008_v21 }
  0x8d   : > { %553 = vmatmul.bf16.gmra.mxu2 %v1004_v22 }
  0x8e   : > { %578 = vmatmul.bf16.gmra.mxu3 %v1009_v23 }
  0xca   : > { %v504_v24 = vpop.f32.mrf.mxu0 }
  0xcb   : > { %v524_v33 = vpop.f32.mrf.mxu1  ;;  %v505_v43 = vadd.f32 %v1494_v38, %v504_v24 }
  0xcc   : > { %v525_v2 = vadd.f32 %v1494_v38, %v524_v33 }
  0xcd   : > { %v584_v48 = vmax.f32 %v505_v43, 0.0 }
  0xce   : > { %v592_v10 = vmax.f32 %v525_v2, 0.0 }
  0xd0   : > { %v534_v25 = vpop.f32.mrf.mxu2 }
  0xd1   : > { %v1485_v27 = vpop.f32.mrf.mxu3  ;;  %v535_v17 = vadd.f32 %v1494_v38, %v534_v25 }
  0xd2   : > { %v506_v26 = vpop.f32.mrf.mxu0 }
  0xd3   : > { %v526_v39 = vpop.f32.mrf.mxu1  ;;  %v507_v42 = vadd.f32 %v1494_v38, %v506_v26  ;;  %v596_v23 = vmax.f32 %v535_v17, 0.0 }
  0xd4   : > { %v527_v5 = vadd.f32 %v1494_v38, %v526_v39 }
  0xd5   : > { %v585_v45 = vmax.f32 %v507_v42, 0.0 }
  0xd6   : > { %v593_v14 = vmax.f32 %v527_v5, 0.0 }
  0xd7   : > { %v617_v52 = vadd.f32 %v585_v45, %v584_v48 }
  0xd8   : > { %v536_v28 = vpop.f32.mrf.mxu2 }
  0xd9   : > { %v1487_v30 = vpop.f32.mrf.mxu3  ;;  %v537_v20 = vadd.f32 %v1494_v38, %v536_v28 }
  0xda   : > { %v509_v29 = vpop.f32.mrf.mxu0 }
  0xdb   : > { %v510_v44 = vadd.f32 %v1494_v38, %v509_v29  ;;  %v529_v55 = vpop.f32.mrf.mxu1  ;;  %v597_v33 = vmax.f32 %v537_v20, 0.0 }
  0xdc   : > { %v530_v11 = vadd.f32 %v1494_v38, %v529_v55 }
  0xdd   : > { %v586_v49 = vmax.f32 %v510_v44, 0.0 }
  0xde   : > { %v594_v18 = vmax.f32 %v530_v11, 0.0 }
  0xdf   : > { %v618_v57 = vadd.f32 %v617_v52, %v586_v49 }
  0xe0   : > { %v539_v31 = vpop.f32.mrf.mxu2 }
  0xe1   : > { %v1489_v35 = vpop.f32.mrf.mxu3  ;;  %v540_v24 = vadd.f32 %v1494_v38, %v539_v31  ;;  %v1024_v31 = vld [vmem:[#allocation8 + $0x30] sm:$0xff] }
  0xe2   : > { %v511_v32 = vpop.f32.mrf.mxu0 }
  0xe3   : > { %v512_v46 = vadd.f32 %v1494_v38, %v511_v32  ;;  %v531_v8 = vpop.f32.mrf.mxu1  ;;  %v598_v42 = vmax.f32 %v540_v24, 0.0 }
  0xe4   : > { %v532_v16 = vadd.f32 %v1494_v38, %v531_v8 }
  0xe5   : > { %v587_v53 = vmax.f32 %v512_v46, 0.0  ;;  %v1319_v46 = vmov 0.0  }
  0xe6   : > { %v595_v21 = vmax.f32 %v532_v16, 0.0  ;;  %298 = vst [vmem:[#allocation2] sm:$0x1] %v1319_v46 }
  0xe7   : > { %v619_v60 = vadd.f32 %v618_v57, %v587_v53 }
  0xe8   : > { %v541_v34 = vpop.f32.mrf.mxu2 }
  0xe9   : > { %v1496_v41 = vpop.f32.mrf.mxu3 }
  0xea   : > { %v514_v36 = vpop.f32.mrf.mxu0 }
  0xeb   : > { %v515_v50 = vadd.f32 %v1494_v38, %v514_v36  ;;  %v542_v36 = vadd.f32 %v1494_v38, %v541_v34 }
  0xed   : > { %v588_v58 = vmax.f32 %v515_v50, 0.0  ;;  %v599_v44 = vmax.f32 %v542_v36, 0.0 }
  0xef   : > { %v620_v63 = vadd.f32 %v619_v60, %v588_v58 }
  0xf0   : > { %v544_v37 = vpop.f32.mrf.mxu2 }
  0xf1   : > { %v1504_v56 = vpop.f32.mrf.mxu3  ;;  %v545_v25 = vadd.f32 %v1494_v38, %v544_v37 }
  0xf2   : > { %v516_v40 = vpop.f32.mrf.mxu0 }
  0xf3   : > { %v517_v54 = vadd.f32 %v1494_v38, %v516_v40  ;;  %v1025_v40 = vld [vmem:[#allocation8 + $0x38] sm:$0xff]  ;;  %v600_v48 = vmax.f32 %v545_v25, 0.0 }
  0xf4   : > { %727 = vmatpush.bf16.msrb.mxu1 %v1025_v40 }
  0xf5   : > { %v589_v61 = vmax.f32 %v517_v54, 0.0  ;;  %v1023_v54 = vld [vmem:[#allocation8 + $0x28] sm:$0xff] }
  0xf7   : > { %v621_v3 = vadd.f32 %v620_v63, %v589_v61  ;;  %v1022_v61 = vld [vmem:[#allocation8 + $0x20] sm:$0xff] }
  0xf8   : > { %v546_v47 = vpop.f32.mrf.mxu2  ;;  %728 = vmatpush.bf16.msrb.mxu1 %v1024_v31  ;;  %v616_v31 = vld [vmem:[#allocation2] sm:$0x1] }
  0xf9   : > { %v1510_v9 = vpop.f32.mrf.mxu3  ;;  %v547_v28 = vadd.f32 %v1494_v38, %v546_v47 }
  0xfa   : > { %v519_v51 = vpop.f32.mrf.mxu0 }
  0xfb   : > { %v520_v59 = vadd.f32 %v1494_v38, %v519_v51  ;;  %v601_v34 = vmax.f32 %v547_v28, 0.0 }
  0xfc   : > { %729 = vmatpush.bf16.msrb.mxu1 %v1023_v54 }
  0xfd   : > { %v590_v0 = vmax.f32 %v520_v59, 0.0 }
  0xff   : > { %v622_v6 = vadd.f32 %v621_v3, %v590_v0 }
 0x100   : > { %v549_v62 = vpop.f32.mrf.mxu2  ;;  %730 = vmatpush.bf16.msrb.mxu1 %v1022_v61 }
 0x101   : > { %v574_v32 = vpop.f32.mrf.mxu3  ;;  %v550_v49 = vadd.f32 %v1494_v38, %v549_v62  ;;  %v560_v62 = vadd.f32 %v1494_v38, %v1485_v27  ;;  %v567_v27 = vadd.f32 %v1494_v38, %v1496_v41  ;;  %v1018_v41 = vld [vmem:[#allocation8] sm:$0xff] }
 0x102   : > { %v521_v1 = vpop.f32.mrf.mxu0 }
 0x103   : > { %v522_v4 = vadd.f32 %v1494_v38, %v521_v1  ;;  %v602_v55 = vmax.f32 %v550_v49, 0.0  ;;  %v562_v1 = vadd.f32 %v1494_v38, %v1487_v30  ;;  %v606_v5 = vmax.f32 %v560_v62, 0.0 }
 0x104   : > { %v570_v30 = vadd.f32 %v1494_v38, %v1504_v56  ;;  %v609_v16 = vmax.f32 %v567_v27, 0.0 }
 0x105   : > { %v591_v7 = vmax.f32 %v522_v4, 0.0  ;;  %v1021_v4 = vld [vmem:[#allocation8 + $0x18] sm:$0xff] }
 0x106   : > { %731 = vmatpush.bf16.msrb.mxu1 %v1021_v4 }
 0x107   : > { %v623_v12 = vadd.f32 %v622_v6, %v591_v7  ;;  %v565_v6 = vadd.f32 %v1494_v38, %v1489_v35  ;;  %v572_v35 = vadd.f32 %v1494_v38, %v1510_v9 }
 0x108   : > { %v551_v13 = vpop.f32.mrf.mxu2 }
 0x109   : > { %v624_v15 = vadd.f32 %v623_v12, %v592_v10  ;;  %v552_v51 = vadd.f32 %v1494_v38, %v551_v13  ;;  %v576_v37 = vpop.f32.mrf.mxu3  ;;  %v607_v10 = vmax.f32 %v562_v1, 0.0  ;;  %v1020_v12 = vld [vmem:[#allocation8 + $0x10] sm:$0xff]  ;;  %v608_v13 = vmax.f32 %v565_v6, 0.0 }
 0x10a   : > { %732 = vmatpush.bf16.msrb.mxu1 %v1020_v12 }
 0x10b   : > { %v625_v19 = vadd.f32 %v624_v15, %v593_v14  ;;  %v603_v58 = vmax.f32 %v552_v51, 0.0  ;;  %v1019_v15 = vld [vmem:[#allocation8 + $0x8] sm:$0xff]  ;;  %v678_v51 = vld [vmem:[%s1586_s4] sm:$0x1] }
 0x10d   : > { %v626_v22 = vadd.f32 %v625_v19, %v594_v18  ;;  %v610_v18 = vmax.f32 %v570_v30, 0.0  ;;  %v575_v19 = vadd.f32 %v1494_v38, %v574_v32 }
 0x10e   : > { %733 = vmatpush.bf16.msrb.mxu1 %v1019_v15 }
 0x10f   : > { %v627_v26 = vadd.f32 %v626_v22, %v595_v21  ;;  %v611_v21 = vmax.f32 %v572_v35, 0.0  ;;  %v577_v22 = vadd.f32 %v1494_v38, %v576_v37  ;;  %v612_v56 = vmax.f32 %v575_v19, 0.0 }
 0x110   : > { %v554_v29 = vpop.f32.mrf.mxu2 }
 0x111   : > { %v628_v39 = vadd.f32 %v627_v26, %v596_v23  ;;  %v555_v47 = vadd.f32 %v1494_v38, %v554_v29  ;;  %v579_v8 = vpop.f32.mrf.mxu3 }
 0x112   : > { %v580_v29 = vadd.f32 %v1494_v38, %v579_v8  ;;  %734 = vmatpush.bf16.msrb.mxu1 %v1018_v41 }
 0x113   : > { %v629_v43 = vadd.f32 %v628_v39, %v597_v33  ;;  %v604_v0 = vmax.f32 %v555_v47, 0.0  ;;  %v613_v33 = vmax.f32 %v577_v22, 0.0 }
 0x114   : > { %v614_v40 = vmax.f32 %v580_v29, 0.0 }
 0x115   : > { %v630_v45 = vadd.f32 %v629_v43, %v598_v42 }
 0x117   : > { %v631_v50 = vadd.f32 %v630_v45, %v599_v44 }
 0x118   : > { %v556_v53 = vpop.f32.mrf.mxu2 }
 0x119   : > { %v632_v52 = vadd.f32 %v631_v50, %v600_v48  ;;  %v557_v60 = vadd.f32 %v1494_v38, %v556_v53  ;;  %v581_v24 = vpop.f32.mrf.mxu3 }
 0x11a   : > { %v582_v9 = vadd.f32 %v1494_v38, %v581_v24 }
 0x11b   : > { %v633_v57 = vadd.f32 %v632_v52, %v601_v34  ;;  %v605_v3 = vmax.f32 %v557_v60, 0.0 }
 0x11c   : > { %v615_v42 = vmax.f32 %v582_v9, 0.0 }
 0x11d   : > { %v634_v59 = vadd.f32 %v633_v57, %v602_v55 }
 0x11f   : > { %v635_v63 = vadd.f32 %v634_v59, %v603_v58 }
 0x121   : > { %v636_v2 = vadd.f32 %v635_v63, %v604_v0 }
 0x123   : > { %v637_v7 = vadd.f32 %v636_v2, %v605_v3 }
 0x125   : > { %v638_v11 = vadd.f32 %v637_v7, %v606_v5 }
 0x127   : > { %v639_v14 = vadd.f32 %v638_v11, %v607_v10 }
 0x129   : > { %v640_v17 = vadd.f32 %v639_v14, %v608_v13 }
 0x12b   : > { %v641_v20 = vadd.f32 %v640_v17, %v609_v16 }
 0x12d   : > { %v642_v23 = vadd.f32 %v641_v20, %v610_v18 }
 0x12f   : > { %v643_v26 = vadd.f32 %v642_v23, %v611_v21 }
 0x131   : > { %v644_v36 = vadd.f32 %v643_v26, %v612_v56 }
 0x133   : > { %v645_v39 = vadd.f32 %v644_v36, %v613_v33 }
 0x135   : > { %v646_v32 = vadd.f32 %v645_v39, %v614_v40 }
 0x137   : > { %v647_v25 = vadd.f32 %v646_v32, %v615_v42 }
 0x139   : > { %v648_v43 = vrot.slane %v647_v25, 4 }
 0x13b   : > { %v649_v44 = vadd.f32 %v648_v43, %v647_v25 }
 0x13d   : > { %v650_v28 = vrot.slane %v649_v44, 2 }
 0x13f   : > { %v651_v45 = vadd.f32 %v650_v28, %v649_v44 }
 0x141   : > { %v652_v46 = vrot.slane %v651_v45, 1 }
 0x143   : > { %v653_v48 = vadd.f32 %v652_v46, %v651_v45 }
 0x145   : > { %v654_v49 = vadd.f32 %v653_v48, %v616_v31 }
 0x147   : > { %655 = vst [vmem:[#allocation2] sm:$0x1] %v654_v49 }
 0x14e   : > { %v659_v50 = vld [vmem:[#allocation2] sm:$0x1] }
 0x14f   : > { %v660_v34 = vmul.f32 0.00390625, %v659_v50 }
 0x151   : > { %v661_v38 = vpack.c.bf16 %v660_v34, %v660_v34 }
 0x153   : > { %735 = vmatmul.bf16.vlgmr.msrb.gmra.mxu1 %v661_v38 }
 0x1d0   : > { %v736_v52 = vpop.f32.mrf.mxu1 }
 0x1d1   : > { %v737_v53 = vadd.f32 %v736_v52, %v678_v51 }
 0x1d3   : > { %740 = vst [vmem:[%s292_s6] sm:$0x1] %v737_v53 }
 0x1d4   : > { %1254 = shalt.err (!%p1251_p0)
}
 0x1d5   : > { %1060 = dma.vmem_to_hbm [thread:$0]  (%p1432_p2), %s753_s10, 16, %s755_s11, %s742_s12  }
 0x1d8   : > { %v738_v37 = vpop.f32.mrf.mxu1 }
 0x1d9 PF: > { %s766_s25 = sand.u32 1, %s1293_s18   ;;  %p1074_p4 = pnand %p855_p10, %p1397_p5 }
 0x1da   : > { %s767_s3 = scalar_lea.sflag [#allocation5], %s766_s25 }
 0x1db   : > { %p1075_p6 = pneg %p1074_p4 }
 0x1dd   : > { %1288 = dma.done.wait (%p1075_p6), %s767_s3, 16  }
 0x1de   : > { %1290 = vsyncadd (%p1075_p6), %s767_s3, 4294967280  ;;  %s22_s23 = sadd.s32 1, %s1313_s23   ;;  %s1601_s18 = smov %s1297_s19 }
 0x1df   : > { %p19_p8 = scmp.ge.s32.totalorder %s22_s23, 4   ;;  %s1602_s19 = smov %s1301_s20 }
 0x1e0   : > { %s1603_s20 = smov %s1442_s9  ;;  %s1604_s21 = smov %s1309_s22 }
 0x1e1   : > { %s1605_s22 = smov %s1607_s17  ;;  %21 = sbr.rel (!%p19_p8) target bundleno = 10 (0xa), region = 101 }
 0x1e6   :  { %772 = vsyncpa [#allocation4], 1 }
 0x1e7   :  { %774 = vsyncpa [#allocation4 + $0x1], 1 }
 0x1e8   :  { %775 = vsyncpa [#allocation7], 1 }
 0x1e9   :  { %776 = vsyncpa [#allocation5], 1 }
 0x1ea   :  { %778 = vsyncpa [#allocation5 + $0x1], 1 }

</bundles_post_ra>
